<compile_context>
chip_gen: v7x
topology: tpu7x:2x2x1
jax: 0.10.0
libtpu: 0.0.40
codegen_flags: <defaults>
</compile_context>

<pallas_src>
import functools

import jax
import jax.numpy as jnp
from jax import lax
from jax.experimental import pallas as pl
from jax.experimental.pallas import tpu as pltpu


def _dtype_min(dtype):
    if jnp.issubdtype(dtype, jnp.floating):
        return float(jnp.finfo(dtype).min)
    return int(jnp.iinfo(dtype).min)


def _max_pool_kernel(x_ref, m_ref, o_ref, *, seq_len, tile_s, fill, neg, mask_s_tail):
    # x_ref: (TB, tS, tH)  hidden-state tile
    # m_ref: (TB, tS, 1)   int8 mask tile (S on sublanes -> broadcast over H is a lane splat)
    # o_ref: (TB, tH)      output tile, resident across the S grid axis (used as accumulator)
    s = pl.program_id(2)

    @pl.when(s == 0)
    def _init():
        o_ref[...] = jnp.full(o_ref.shape, neg, o_ref.dtype)

    x = x_ref[...]
    m = m_ref[...]
    masked = jnp.where(m != 0, x, jnp.asarray(fill, dtype=x.dtype))
    if mask_s_tail:
        # Last S block may be partial: out-of-range positions hold garbage -> force to
        # dtype-min so they can never win the max.
        pos = lax.broadcasted_iota(jnp.int32, m.shape, 1) + s * tile_s
        masked = jnp.where(pos < seq_len, masked, jnp.asarray(neg, dtype=x.dtype))

    o_ref[...] = jnp.maximum(o_ref[...], jnp.max(masked, axis=1))


def max_pooling(last_hidden_state, attention_mask, *, block_bytes=None):
    """Masked max pooling over the sequence dimension.

    last_hidden_state: [B, S, H]
    attention_mask:    [B, S] (0 = padded, nonzero = valid)
    returns:           [B, H]
    """
    B, S, H = last_hidden_state.shape
    dtype = last_hidden_state.dtype
    itemsize = jnp.dtype(dtype).itemsize

    # Block budget: ~8 MiB default (fits v7x's 64 MiB VMEM comfortably when
    # double-buffered); go bigger on 128 MiB-VMEM chips (v5e/v6e).
    if block_bytes is None:
        block_bytes = 8 << 20
        try:
            if pltpu.get_tpu_info().vmem_capacity_bytes >= (96 << 20):
                block_bytes = 16 << 20
        except Exception:
            pass
    block_bytes = min(int(block_bytes), 16 << 20)

    # Batch rows per grid step: a full sublane group in the (TB, tH) output tile
    # (8 f32 / 16 bf16), or the whole (small) batch so the block equals the full dim.
    tb_target = max(8, 8 * (4 // max(1, itemsize)))
    TB = min(tb_target, B)
    nb = pl.cdiv(B, TB)

    # Hidden tile: prefer full H. Only split to get >= 2 parallel grid points (v7x has
    # 2 TensorCores sharing HBM bandwidth) when the batch alone gives a single block.
    tH = H
    if nb < 2 and tH % 256 == 0:
        tH //= 2

    # Sequence tile: full S if the (x + lane-padded int8 mask) block fits the budget;
    # otherwise a multiple of 32 derived from the budget, splitting H (128-multiples)
    # only if tS would collapse below ~64 sublanes.
    def _ts_for(th):
        per_row = TB * (th * itemsize + 128)  # x row + lane-padded int8 mask row
        return (block_bytes // per_row) // 32 * 32

    if TB * S * (tH * itemsize + 128) <= block_bytes:
        tS = S
    else:
        tS = _ts_for(tH)
        while tS < 64 and tH % 256 == 0:
            tH //= 2
            tS = _ts_for(tH)
        tS = max(32, tS)
        if tS >= S:
            tS = S

    grid = (pl.cdiv(B, TB), H // tH, pl.cdiv(S, tS))

    # int8 mask shaped [B, S, 1]: S sits on sublanes, the size-1 lane dim broadcasts
    # over H for free; int8 keeps the lane-padded VMEM tile 4x smaller than int32.
    m = (attention_mask != 0).astype(jnp.int8).reshape(B, S, 1)

    neg = _dtype_min(dtype)
    fill = 0.0001 if jnp.issubdtype(dtype, jnp.floating) else 0

    kernel = functools.partial(
        _max_pool_kernel,
        seq_len=S, tile_s=tS, fill=fill, neg=neg, mask_s_tail=(S % tS != 0),
    )

    # VMEM accounting: double-buffered x / mask / out blocks (mask lane-pads to 128 lanes).
    x_blk = TB * tS * tH * itemsize
    m_blk = TB * tS * 128
    o_blk = max(TB, 8) * max(tH, 128) * itemsize
    needed = 2 * (x_blk + m_blk + o_blk) + (4 << 20)
    vmem_limit = int(min(max(needed, 32 << 20), 56 << 20))

    return pl.pallas_call(
        kernel,
        out_shape=jax.ShapeDtypeStruct((B, H), dtype),
        grid_spec=pltpu.PrefetchScalarGridSpec(
            num_scalar_prefetch=0,
            grid=grid,
            in_specs=[
                pl.BlockSpec((TB, tS, tH), lambda b, h, s: (b, s, h)),
                pl.BlockSpec((TB, tS, 1), lambda b, h, s: (b, s, 0)),
            ],
            out_specs=pl.BlockSpec((TB, tH), lambda b, h, s: (b, h)),
        ),
        compiler_params=pltpu.CompilerParams(
            dimension_semantics=("parallel", "parallel", "arbitrary"),
            vmem_limit_bytes=vmem_limit,
        ),
    )(last_hidden_state, m)


def max_pooling_ref(last_hidden_state, attention_mask):
    """Pure-JAX reference replicating the PyTorch semantics."""
    mask = attention_mask[..., None]
    fill = jnp.asarray(0.0001, dtype=last_hidden_state.dtype)
    emb = jnp.where(mask == 0, fill, last_hidden_state)
    return jnp.max(emb, axis=1)


if __name__ == "__main__":
    key = jax.random.PRNGKey(0)
    k1, k2 = jax.random.split(key)

    # Test 1: small shape, single block (fast path: tS = S, full H).
    B, S, H = 2, 8, 32
    x = jax.random.normal(k1, (B, S, H), dtype=jnp.float32)
    lengths = jnp.array([5, 3], dtype=jnp.int32)
    mask = (jnp.arange(S)[None, :] < lengths[:, None]).astype(jnp.int32)

    out = jax.block_until_ready(max_pooling(x, mask))
    ref = max_pooling_ref(x, mask)
    assert out.shape == (B, H), out.shape
    assert jnp.allclose(out, ref, atol=1e-6), "mismatch vs reference (test 1)"

    # Test 2: force tiling (tiny block budget) to exercise the partial B block,
    # the in-kernel S-tail masking, and the cross-step max accumulation.
    B2, S2, H2 = 9, 40, 128
    x2 = jax.random.normal(k2, (B2, S2, H2), dtype=jnp.float32)
    lengths2 = jnp.array([40, 0, 17, 33, 5, 40, 1, 32, 39], dtype=jnp.int32)
    mask2 = (jnp.arange(S2)[None, :] < lengths2[:, None]).astype(jnp.int32)

    out2 = jax.block_until_ready(max_pooling(x2, mask2, block_bytes=16384))
    ref2 = max_pooling_ref(x2, mask2)
    assert out2.shape == (B2, H2), out2.shape
    assert jnp.allclose(out2, ref2, atol=1e-6), "mismatch vs reference (test 2)"

    print("KERNEL_OK")
</pallas_src>

<mosaic_0001>
module attributes {stable_mosaic.version = 11 : i64} {
  func.func @_max_pool_kernel(%arg0: i32, %arg1: i32, %arg2: i32, %arg3: memref<2x8x32xf32, #tpu.memory_space<vmem>>, %arg4: memref<2x8x1xi8, #tpu.memory_space<vmem>>, %arg5: memref<2x32xf32, #tpu.memory_space<vmem>>) attributes {dimension_semantics = [#tpu.dimension_semantics<parallel>, #tpu.dimension_semantics<parallel>, #tpu.dimension_semantics<arbitrary>], iteration_bounds = array<i64: 1, 1, 1>, scalar_prefetch = 0 : i64, scratch_operands = 0 : i64, tpu.core_type = #tpu.core_type<tc>, window_params = [{transform_indices = @transform_0, window_bounds = array<i64: 2, 8, 32>}, {transform_indices = @transform_1, window_bounds = array<i64: 2, 8, 1>}, {transform_indices = @transform_2, window_bounds = array<i64: 2, 32>}]} {
    %c0_i32 = arith.constant 0 : i32
    %0 = arith.cmpi eq, %arg2, %c0_i32 : i32
    %1 = arith.extui %0 : i1 to i32
    %c0_i32_0 = arith.constant 0 : i32
    %2 = arith.cmpi ne, %1, %c0_i32_0 : i32
    scf.if %2 {
      %cst_11 = arith.constant -3.40282347E+38 : f32
      %15 = vector.broadcast %cst_11 : f32 to vector<2x32xf32>
      %c0_12 = arith.constant 0 : index
      %c0_13 = arith.constant 0 : index
      %16 = vector.load %arg5[%c0_12, %c0_13] : memref<2x32xf32, #tpu.memory_space<vmem>>, vector<2x32xf32>
      tpu.vector_store %arg5[%c0_12, %c0_13], %15 {strides = array<i32>} : memref<2x32xf32, #tpu.memory_space<vmem>>, vector<2x32xf32>,
    } else {
    }
    %c0 = arith.constant 0 : index
    %c0_1 = arith.constant 0 : index
    %c0_2 = arith.constant 0 : index
    %3 = vector.load %arg3[%c0, %c0_1, %c0_2] : memref<2x8x32xf32, #tpu.memory_space<vmem>>, vector<2x8x32xf32>
    %c0_3 = arith.constant 0 : index
    %c0_4 = arith.constant 0 : index
    %c0_5 = arith.constant 0 : index
    %4 = vector.load %arg4[%c0_3, %c0_4, %c0_5] : memref<2x8x1xi8, #tpu.memory_space<vmem>>, vector<2x8x1xi8>
    %c0_i8 = arith.constant 0 : i8
    %5 = vector.broadcast %c0_i8 : i8 to vector<2x8x1xi8>
    %6 = arith.cmpi ne, %4, %5 : vector<2x8x1xi8>
    %cst = arith.constant 9.99999974E-5 : f32
    %7 = vector.shape_cast %6 : vector<2x8x1xi1> to vector<2x8x1xi1>
    %8 = vector.broadcast %7 : vector<2x8x1xi1> to vector<2x8x32xi1>
    %9 = vector.broadcast %cst : f32 to vector<2x8x32xf32>
    %10 = arith.select %8, %3, %9 : vector<2x8x32xi1>, vector<2x8x32xf32>
    %c0_6 = arith.constant 0 : index
    %c0_7 = arith.constant 0 : index
    %11 = vector.load %arg5[%c0_6, %c0_7] : memref<2x32xf32, #tpu.memory_space<vmem>>, vector<2x32xf32>
    %cst_8 = arith.constant dense<0xFF800000> : vector<2x32xf32>
    %12 = vector.multi_reduction <maximumf>, %10, %cst_8 [1] : vector<2x8x32xf32> to vector<2x32xf32>
    %13 = arith.maximumf %11, %12 : vector<2x32xf32>
    %c0_9 = arith.constant 0 : index
    %c0_10 = arith.constant 0 : index
    %14 = vector.load %arg5[%c0_9, %c0_10] : memref<2x32xf32, #tpu.memory_space<vmem>>, vector<2x32xf32>
    tpu.vector_store %arg5[%c0_9, %c0_10], %13 {strides = array<i32>} : memref<2x32xf32, #tpu.memory_space<vmem>>, vector<2x32xf32>,
    return
  }
  func.func @transform_0(%arg0: i32, %arg1: i32, %arg2: i32) -> (i32, i32, i32) {
    %c0_i32 = arith.constant 0 : i32
    return %arg0, %arg2, %arg1 : i32, i32, i32
  }
  func.func @transform_1(%arg0: i32, %arg1: i32, %arg2: i32) -> (i32, i32, i32) {
    %c0_i32 = arith.constant 0 : i32
    %c0_i32_0 = arith.constant 0 : i32
    return %arg0, %arg2, %c0_i32 : i32, i32, i32
  }
  func.func @transform_2(%arg0: i32, %arg1: i32, %arg2: i32) -> (i32, i32) {
    %c0_i32 = arith.constant 0 : i32
    return %arg0, %arg1 : i32, i32
  }
}

</mosaic_0001>

<bundles_post_ra>
// kernel: tpu_custom_call.1
= control target key start
LH: loop header
LB: loop body
LE: loop exit
PB: predicated region body
PF: predicated region fallthrough
CT: control target
= control target key end

     0   :  { %7 = vsyncpa [#allocation3], 0  ;;  %s205_s0 = inlined_call_operand.hbm [shape: f32[2,8,32], index: 0, kind: input, shape index: {}]   ;;  %s206_s1 = inlined_call_operand.vmem [shape: s8[2,8,1], index: 1, kind: input, shape index: {}]   ;;  %s207_s2 = inlined_call_operand.hbm [shape: f32[2,32], index: 2, kind: output, shape index: {}]  }
   0x1   :  { %8 = vsyncpa [#allocation4], 0  ;;  %s152_s9 = smov [#allocation2]   ;;  %s104_s13 = scalar_lea.hbm %s205_s0, 256 }
   0x2   :  { %s14_s10 = sshll.u32 %s152_s9, 4  ;;  %p105_p0 = scmp.ne.s32.totalorder %s205_s0, %s104_s13  ;;  %s15_s10 = int_to_ptr.vmem [resolvable:$true] %s14_s10 }
   0x3   :  { %p108_p1 = scmp.lt.u32.totalorder %s104_s13, %s205_s0 }
   0x5   :  { %p110_p2 = pnand %p108_p1, %p105_p0 }
   0x7   :  { %113 = shalt.err (!%p110_p2)
}
   0x8   :  { %s114_s18 = scalar_lea.vmem %s15_s10, 256  ;;  %p119_p4 = scmp.lt.s32.totalorder %s15_s10, %s15_s10 }
   0x9   :  { %p115_p3 = scmp.ne.s32.totalorder %s15_s10, %s114_s18  ;;  %p120_p5 = scmp.lt.s32.totalorder %s114_s18, %s114_s18 }
   0xb   :  { %p121_p6 = por %p120_p5, %p119_p4 }
   0xd   :  { %p122_p7 = pnand %p121_p6, %p115_p3 }
   0xf   :  { %125 = shalt.err (!%p122_p7)
}
  0x10   :  { %s153_s19 = smov 128   ;;  %s154_s20 = smov 8  }
  0x11   :  { %20 = dma.hbm_to_vmem [thread:$0]  %s205_s0, 256, %s15_s10, [#allocation3], %s153_s19, %s153_s19, %s154_s20  }
  0x12   :  { %148 = dma.done.wait [#allocation3], 256  }
  0x13   :  { %149 = vsyncadd [#allocation3], 4294967040  ;;  %v155_v0 = vmov 0   ;;  %v36_v1 = vld [vmem:[%s206_s1] sm:$0x3]  ;;  %vm32_vm4 = vcmask 254976  }
  0x14   :  { %103 = vset.pattern.permute.xlu0 %v155_v0  ;;  %v37_v2 = vld [vmem:[%s206_s1 + $0x2] sm:$0x3]  ;;  %vm38_vm0 = vnez %v36_v1  ;;  %v156_v9 = vmov -3.4028235e+38   ;;  %vm59_vm5 = vcmask 261120   ;;  %v35_v14 = vld [vmem:[#allocation2 + $0x8] sm:$0xff] }
  0x15   :  { %vm39_vm1 = vnez %v37_v2  ;;  %v40_v3 = vsel %vm38_vm0, 16843009, %v155_v0  ;;  %33 = vst.msk [vmem:[#allocation5] sm:$0x3] %vm32_vm4, %v156_v9  ;;  %v34_v10 = vld [vmem:[#allocation2] sm:$0xff]  ;;  %vm76_vm8 = vcmask 1041409  }
  0x16   :  { %v41_v4 = vsel %vm39_vm1, 16843009, %v155_v0  ;;  %v42_v5 = vunpack.c.0.s8 %v40_v3  ;;  %s157_s0 = smov [#allocation5]  }
  0x17   :  { %v43_v6 = vunpack.c.0.s8 %v41_v4  ;;  %s88_s1 = sshll.u32 %s157_s0, 4  ;;  %s89_s1 = int_to_ptr.vmem [resolvable:$true] %s88_s1 }
  0x18   :  { %vm44_vm2 = vcmp.ne.s32.totalorder %v42_v5, 0  ;;  %s126_s27 = scalar_lea.vmem %s89_s1, 32  ;;  %p131_p9 = scmp.lt.s32.totalorder %s89_s1, %s89_s1 }
  0x19   :  { %vm45_vm3 = vcmp.ne.s32.totalorder %v43_v6, 0  ;;  %v46_v7 = vsel %vm44_vm2, 1, %v155_v0  ;;  %p127_p8 = scmp.ne.s32.totalorder %s89_s1, %s126_s27  ;;  %p132_p10 = scmp.lt.s32.totalorder %s126_s27, %s126_s27 }
  0x1a   :  { %49 = vperm.xlu0 %103, %v46_v7   ;;  %v47_v8 = vsel %vm45_vm3, 1, %v155_v0 }
  0x1b   :  { %p133_p11 = por %p132_p10, %p131_p9 }
  0x1c   :  { %v58_v30 = vld [vmem:[#allocation5] sm:$0x3] }
  0x1d   :  { %p134_p12 = pnand %p133_p11, %p127_p8 }
  0x1e   :  { %52 = vperm.xlu0 %103, %v47_v8  }
  0x99   :  { %v50_v11 = vpop.permute.xlu0 %49 }
  0x9a   :  { %vm54_vm6 = vcmp.eq.s32.totalorder %v50_v11, 1 }
  0x9b   :  { %v56_v12 = vsel %vm54_vm6, %v34_v10, 0.0001 }
  0x9c   :  { %v60_v13 = vsel %vm59_vm5, %v56_v12, -inf }
  0x9d   :  { %v61_v15 = vrot.slane %v60_v13, 4  ;;  %v53_v16 = vpop.permute.xlu0 %52 }
  0x9e   :  { %vm55_vm7 = vcmp.eq.s32.totalorder %v53_v16, 1 }
  0x9f   :  { %v62_v17 = vmax.f32 %v60_v13, %v61_v15  ;;  %v57_v18 = vsel %vm55_vm7, %v35_v14, 0.0001 }
  0xa0   :  { %v67_v19 = vsel %vm59_vm5, %v57_v18, -inf }
  0xa1   :  { %v63_v20 = vrot.slane %v62_v17, 2  ;;  %v68_v21 = vrot.slane %v67_v19, 4 }
  0xa3   :  { %v64_v22 = vmax.f32 %v62_v17, %v63_v20  ;;  %v69_v23 = vmax.f32 %v67_v19, %v68_v21 }
  0xa5   :  { %v70_v24 = vrot.slane %v69_v23, 2  ;;  %v65_v25 = vrot.slane %v64_v22, 1 }
  0xa7   :  { %v71_v26 = vmax.f32 %v69_v23, %v70_v24  ;;  %v66_v28 = vmax.f32 %v64_v22, %v65_v25 }
  0xa9   :  { %v72_v27 = vrot.slane %v71_v26, 1 }
  0xab   :  { %v73_v29 = vmax.f32 %v71_v26, %v72_v27 }
  0xad   :  { %v77_v31 = vsel %vm76_vm8, %v73_v29, %v66_v28 }
  0xae   :  { %v79_v32 = vmax.f32 %v58_v30, %v77_v31 }
  0xb0   :  { %81 = vst.msk [vmem:[#allocation5] sm:$0x3] %vm32_vm4, %v79_v32 }
  0xb1   :  { %137 = shalt.err (!%p134_p12)
}
  0xb2   :  { %s138_s30 = scalar_lea.hbm %s207_s2, 32 }
  0xb3   :  { %p139_p13 = scmp.ne.s32.totalorder %s207_s2, %s138_s30  ;;  %p142_p0 = scmp.lt.u32.totalorder %s138_s30, %s207_s2 }
  0xb5   :  { %p144_p1 = pnand %p142_p0, %p139_p13 }
  0xb7   :  { %147 = shalt.err (!%p144_p1)
}
  0xb8   :  { %91 = dma.vmem_to_hbm [thread:$0]  %s89_s1, 32, %s207_s2, [#allocation4]  }
  0xb9   :  { %150 = dma.done.wait [#allocation4], 32  }
  0xba   :  { %151 = vsyncadd [#allocation4], 4294967264 }
  0xbb   :  { %95 = vsyncpa [#allocation3], 1 }
  0xbc   :  { %96 = vsyncpa [#allocation4], 1 }

</bundles_post_ra>
